<compile_context>
chip_gen: v6e
topology: v6e:2x2x1
jax: 0.10.0
libtpu: 0.0.40
codegen_flags: <defaults>
</compile_context>

<pallas_src>
import functools
import math

import jax
import jax.numpy as jnp
from jax.experimental import pallas as pl
from jax.experimental.pallas import tpu as pltpu

# ---- config (small, Llama-like) ------------------------------------------
BATCH = 2
SEQ = 8
HIDDEN = 128
NUM_HEADS = 4
HEAD_DIM = HIDDEN // NUM_HEADS          # 32
HALF = HEAD_DIM // 2                    # 16
INTERMEDIATE = 256
RMS_EPS = 1e-6
ROPE_THETA = 10000.0
BS = BATCH * SEQ

_VMEM_SPEC = pl.BlockSpec(memory_space=pltpu.MemorySpace.VMEM)


def _rmsnorm(x, w):
    # x: (BS, H) fp32, w: (1, H) fp32
    var = jnp.mean(x * x, axis=-1, keepdims=True)
    return x * jax.lax.rsqrt(var + RMS_EPS) * w


def decoder_layer_kernel(x_ref, cos_ref, tnear_ref, tfar_ref, bias_ref,
                         ln1_ref, ln2_ref,
                         wqkv_ref, wo3_ref, wgu_ref, wd_ref,
                         o_ref):
    bf16 = jnp.bfloat16
    x = x_ref[...]                                   # (BS, H) fp32

    # ---- input RMSNorm (fp32, VPU) ----
    h = _rmsnorm(x, ln1_ref[...])

    # ---- fused QKV projection (bf16 MXU, fp32 accumulate) ----
    qkv = jnp.dot(h.astype(bf16), wqkv_ref[...],
                  preferred_element_type=jnp.float32)          # (BS, 3H)
    q = qkv[:, :HIDDEN]                 # 128-lane-aligned slices (cheap)
    k = qkv[:, HIDDEN:2 * HIDDEN]
    v = qkv[:, 2 * HIDDEN:]

    # ---- RoPE, full lane width, fp32; rotate-half via XLU rolls ----
    # rot_half is built from two full-row lane rotations by +-HALF; the lanes
    # that wrap across head (and row) boundaries carry exactly-zero sin
    # coefficients (host-enforced), so the wrap is harmless.
    cos = cos_ref[...]
    tnear = tnear_ref[...]              # multiplies pltpu.roll(x, HALF)
    tfar = tfar_ref[...]                # multiplies pltpu.roll(x, H - HALF)

    def rope(t):
        r_near = pltpu.roll(t, shift=HALF, axis=1)
        r_far = pltpu.roll(t, shift=HIDDEN - HALF, axis=1)
        return t * cos + r_near * tnear + r_far * tfar

    q = rope(q)
    k = rope(k)

    # ---- split heads: (BS, H) -> (NH, BS, HD); one relayout per tensor ----
    def split_heads(t):
        return jnp.transpose(t.reshape(BS, NUM_HEADS, HEAD_DIM), (1, 0, 2))

    qh = split_heads(q).astype(bf16)
    kh = split_heads(k).astype(bf16)
    vh = split_heads(v).astype(bf16)

    # ---- batched causal attention over the head axis ----
    s = jnp.einsum("hqd,hkd->hqk", qh, kh,
                   preferred_element_type=jnp.float32)          # (NH, BS, BS)
    s = s + bias_ref[...]               # additive block-diag causal mask (fp32)
    m = jnp.max(s, axis=-1, keepdims=True)
    p = jnp.exp(s - m)
    l = jnp.sum(p, axis=-1, keepdims=True)
    p = p * pl.reciprocal(l, approx=True)                       # EUP reciprocal

    oh = jnp.einsum("hqk,hkd->hqd", p.astype(bf16), vh,
                    preferred_element_type=jnp.float32)         # (NH, BS, HD)

    # ---- output projection: per-head matmul + head-sum (no lane concat) ----
    attn_h = jnp.einsum("hqd,hdn->hqn", oh.astype(bf16), wo3_ref[...],
                        preferred_element_type=jnp.float32)     # (NH, BS, H)
    attn = jnp.sum(attn_h, axis=0)                              # (BS, H)

    x1 = x + attn                                    # residual 1 (fp32)

    # ---- post-attention RMSNorm + SwiGLU MLP (fused gate/up) ----
    h2 = _rmsnorm(x1, ln2_ref[...])
    gu = jnp.dot(h2.astype(bf16), wgu_ref[...],
                 preferred_element_type=jnp.float32)            # (BS, 2I)
    gate = gu[:, :INTERMEDIATE]
    up = gu[:, INTERMEDIATE:]
    act = gate * jax.lax.logistic(gate)              # SiLU, fp32
    mlp = jnp.dot((act * up).astype(bf16), wd_ref[...],
                  preferred_element_type=jnp.float32)           # (BS, H)

    o_ref[...] = x1 + mlp                            # residual 2


@functools.lru_cache(maxsize=1)
def _roll_is_jnp_direction():
    """One-time calibration of pltpu.roll's lane-rotation direction.

    Returns True if pltpu.roll(x, s)[i] == x[(i - s) % n] (jnp.roll semantics).
    """
    def probe(x_ref, o_ref):
        o_ref[...] = pltpu.roll(x_ref[...], shift=HALF, axis=1)

    x = jax.lax.broadcasted_iota(jnp.float32, (8, HIDDEN), 1)
    out = pl.pallas_call(
        probe,
        out_shape=jax.ShapeDtypeStruct((8, HIDDEN), jnp.float32),
        in_specs=[_VMEM_SPEC],
        out_specs=_VMEM_SPEC,
    )(x)
    return int(jax.block_until_ready(out)[0, 0]) == HIDDEN - HALF


def llama_decoder_layer(x, cos, sin, params):
    B, S, H = x.shape
    assert (B, S, H) == (BATCH, SEQ, HIDDEN)
    assert HEAD_DIM % 2 == 0
    bf16 = jnp.bfloat16
    scale = 1.0 / math.sqrt(HEAD_DIM)

    # Host-side weight prep: fuse QKV / gate-up, fold attention scale, cast
    # bf16, reshape W_o to (NH, HD, H) for the per-head output projection.
    wqkv = jnp.concatenate(
        [params["wq"] * scale, params["wk"], params["wv"]], axis=1).astype(bf16)
    wgu = jnp.concatenate([params["wg"], params["wu"]], axis=1).astype(bf16)
    wo3 = params["wo"].astype(bf16).reshape(NUM_HEADS, HEAD_DIM, HIDDEN)
    wd = params["wd"].astype(bf16)
    ln1 = params["ln1"].reshape(1, H)
    ln2 = params["ln2"].reshape(1, H)

    # Host-side RoPE tables, tiled per-head to full lane width, sign folded,
    # masked so every lane that a full-row roll wraps across a head boundary
    # carries an exactly-zero coefficient, then tiled over batch to (B*S, H).
    cos_h = jnp.tile(cos, (1, NUM_HEADS))                    # (S, H)
    sin_h = jnp.tile(sin, (1, NUM_HEADS))                    # (S, H)
    first_half = (jnp.arange(H) % HEAD_DIM) < HALF
    sin_a = jnp.where(first_half, -sin_h, 0.0)               # multiplies x[i+HALF]
    sin_b = jnp.where(first_half, 0.0, sin_h)                # multiplies x[i-HALF]
    cos_f = jnp.tile(cos_h, (B, 1)).astype(jnp.float32)      # (B*S, H)
    sin_af = jnp.tile(sin_a, (B, 1)).astype(jnp.float32)
    sin_bf = jnp.tile(sin_b, (B, 1)).astype(jnp.float32)

    # Bind the sin tables to the rolled operands according to the calibrated
    # hardware roll direction (tnear multiplies roll(x, HALF), tfar multiplies
    # roll(x, H-HALF)).
    if _roll_is_jnp_direction():
        tnear, tfar = sin_bf, sin_af     # roll(x, HALF)[i] == x[i - HALF]
    else:
        tnear, tfar = sin_af, sin_bf     # roll(x, HALF)[i] == x[i + HALF]

    # Host-side additive block-diagonal causal mask (fp32; one vadd in-kernel).
    r = jnp.arange(BS)
    causal = ((r[:, None] // SEQ) == (r[None, :] // SEQ)) & (r[None, :] <= r[:, None])
    bias = jnp.where(causal, 0.0, -1e30).astype(jnp.float32)[None]   # (1, BS, BS)

    x2 = x.reshape(B * S, H)                                 # fold batch on host

    out = pl.pallas_call(
        decoder_layer_kernel,
        out_shape=jax.ShapeDtypeStruct((B * S, H), jnp.float32),
        in_specs=[_VMEM_SPEC] * 11,
        out_specs=_VMEM_SPEC,
    )(x2, cos_f, tnear, tfar, bias, ln1, ln2, wqkv, wo3, wgu, wd)
    return out.reshape(B, S, H)


# ---- pure-JAX reference (mirrors the PyTorch forward; bf16 MXU inputs) -----
def reference(x, cos, sin, p):
    bf16 = jnp.bfloat16

    def mm(a, w):
        return jnp.dot(a.astype(bf16), w.astype(bf16),
                       preferred_element_type=jnp.float32)

    def rms(v, w):
        return v * jax.lax.rsqrt(jnp.mean(v * v, -1, keepdims=True) + RMS_EPS) * w

    def rope(t):  # t: (B, S, nH, hd) fp32
        d = t.shape[-1]
        rot = jnp.concatenate([-t[..., d // 2:], t[..., :d // 2]], axis=-1)
        return t * cos[None, :, None, :] + rot * sin[None, :, None, :]

    B, S, H = x.shape
    scale = 1.0 / math.sqrt(HEAD_DIM)
    h = rms(x, p["ln1"])
    q = mm(h, p["wq"] * scale).reshape(B, S, NUM_HEADS, HEAD_DIM)
    k = mm(h, p["wk"]).reshape(B, S, NUM_HEADS, HEAD_DIM)
    v = mm(h, p["wv"]).reshape(B, S, NUM_HEADS, HEAD_DIM)
    q, k = rope(q), rope(k)
    s = jnp.einsum("bqhd,bkhd->bhqk", q.astype(bf16), k.astype(bf16),
                   preferred_element_type=jnp.float32)
    mask = jnp.tril(jnp.ones((S, S), bool))
    s = jnp.where(mask[None, None], s, -1e30)
    pattn = jax.nn.softmax(s, axis=-1)
    attn = jnp.einsum("bhqk,bkhd->bqhd", pattn.astype(bf16), v.astype(bf16),
                      preferred_element_type=jnp.float32).reshape(B, S, H)
    attn = mm(attn, p["wo"])
    x1 = x + attn
    h2 = rms(x1, p["ln2"])
    g = mm(h2, p["wg"])
    u = mm(h2, p["wu"])
    mlp = mm((g * jax.nn.sigmoid(g)) * u, p["wd"])
    return x1 + mlp


if __name__ == "__main__":
    key = jax.random.PRNGKey(0)
    ks = jax.random.split(key, 9)

    def w(k, shape, scale=0.02):
        return (scale * jax.random.normal(k, shape)).astype(jnp.float32)

    params = {
        "ln1": jnp.ones((HIDDEN,), jnp.float32),
        "ln2": jnp.ones((HIDDEN,), jnp.float32),
        "wq": w(ks[0], (HIDDEN, HIDDEN)),
        "wk": w(ks[1], (HIDDEN, HIDDEN)),
        "wv": w(ks[2], (HIDDEN, HIDDEN)),
        "wo": w(ks[3], (HIDDEN, HIDDEN)),
        "wg": w(ks[4], (HIDDEN, INTERMEDIATE)),
        "wu": w(ks[5], (HIDDEN, INTERMEDIATE)),
        "wd": w(ks[6], (INTERMEDIATE, HIDDEN)),
    }
    x = jax.random.normal(ks[7], (BATCH, SEQ, HIDDEN), jnp.float32)

    # RoPE tables for position_ids = arange(SEQ)
    pos = jnp.arange(SEQ, dtype=jnp.float32)
    inv_freq = 1.0 / (ROPE_THETA ** (jnp.arange(0, HEAD_DIM, 2, dtype=jnp.float32) / HEAD_DIM))
    freqs = pos[:, None] * inv_freq[None, :]
    emb = jnp.concatenate([freqs, freqs], axis=-1)       # (S, HEAD_DIM)
    cos, sin = jnp.cos(emb), jnp.sin(emb)

    out = jax.block_until_ready(llama_decoder_layer(x, cos, sin, params))
    ref = reference(x, cos, sin, params)
    assert out.shape == (BATCH, SEQ, HIDDEN)
    err = float(jnp.max(jnp.abs(out - ref)))
    assert jnp.allclose(out, ref, atol=2e-3, rtol=2e-3), err
    print("KERNEL_OK")
</pallas_src>

<mosaic_0001>
module attributes {stable_mosaic.version = 11 : i64} {
  func.func @probe(%arg0: memref<8x128xf32, #tpu.memory_space<vmem>>, %arg1: memref<8x128xf32, #tpu.memory_space<vmem>>) attributes {dimension_semantics = [], scalar_prefetch = 0 : i64, scratch_operands = 0 : i64, tpu.core_type = #tpu.core_type<tc>} {
    %c0 = arith.constant 0 : index
    %c0_0 = arith.constant 0 : index
    %0 = vector.load %arg0[%c0, %c0_0] : memref<8x128xf32, #tpu.memory_space<vmem>>, vector<8x128xf32>
    %c16_i32 = arith.constant 16 : i32
    %1 = tpu.dynamic_rotate %0 by %c16_i32 dim 1 : vector<8x128xf32>, i32 -> vector<8x128xf32>
    %c0_1 = arith.constant 0 : index
    %c0_2 = arith.constant 0 : index
    %2 = vector.load %arg1[%c0_1, %c0_2] : memref<8x128xf32, #tpu.memory_space<vmem>>, vector<8x128xf32>
    tpu.vector_store %arg1[%c0_1, %c0_2], %1 {strides = array<i32>} : memref<8x128xf32, #tpu.memory_space<vmem>>, vector<8x128xf32>,
    return
  }
}

</mosaic_0001>

<bundles_post_ra>
// kernel: tpu_custom_call.1
= control target key start
LH: loop header
LB: loop body
LE: loop exit
PB: predicated region body
PF: predicated region fallthrough
CT: control target
= control target key end

     0   :  { %6 = vsyncpa [#allocation3], 0  ;;  %s106_s0 = inlined_call_operand.hbm [shape: f32[8,128], index: 0, kind: input, shape index: {}]   ;;  %s107_s1 = inlined_call_operand.hbm [shape: f32[8,128], index: 1, kind: output, shape index: {}]  }
   0x1   :  { %7 = vsyncpa [#allocation4], 0  ;;  %s87_s6 = smov [#allocation2]  }
   0x2   :  { %s14_s7 = sshll.u32 %s87_s6, 4  ;;  %s15_s7 = int_to_ptr.vmem [resolvable:$true] %s14_s7 }
   0x3   :  { %s51_s8 = scalar_lea.vmem %s15_s7, 128  ;;  %p56_p1 = scmp.lt.s32.totalorder %s15_s7, %s15_s7 }
   0x4   :  { %p52_p0 = scmp.ne.s32.totalorder %s15_s7, %s51_s8  ;;  %p57_p2 = scmp.lt.s32.totalorder %s51_s8, %s51_s8 }
   0x6   :  { %p58_p3 = por %p57_p2, %p56_p1 }
   0x8   :  { %p59_p4 = pnand %p58_p3, %p52_p0 }
   0xa   :  { %62 = shalt.err (!%p59_p4)
}
   0xb   :  { %17 = dma.hbm_to_vmem [thread:$0]  %s106_s0, 128, %s15_s7, [#allocation3]  }
   0xc   :  { %83 = dma.done.wait [#allocation3], 128  }
   0xd   :  { %84 = vsyncadd [#allocation3], 4294967168  ;;  %v21_v0 = vld [vmem:[#allocation2] sm:$0xff]  ;;  %s88_s11 = smov 16   ;;  %s89_s12 = smov [#allocation5]  }
   0xe   :  { %22 = vrot.lane.b32.xlu0 %v21_v0, %s88_s11  ;;  %s31_s13 = sshll.u32 %s89_s12, 4  ;;  %s32_s13 = int_to_ptr.vmem [resolvable:$true] %s31_s13 }
   0xf   :  { %s63_s14 = scalar_lea.vmem %s32_s13, 128  ;;  %p68_p6 = scmp.lt.s32.totalorder %s32_s13, %s32_s13 }
  0x10   :  { %p64_p5 = scmp.ne.s32.totalorder %s32_s13, %s63_s14  ;;  %p69_p7 = scmp.lt.s32.totalorder %s63_s14, %s63_s14 }
  0x12   :  { %p70_p8 = por %p69_p7, %p68_p6 }
  0x14   :  { %p71_p9 = pnand %p70_p8, %p64_p5 }
  0x80   :  { %v23_v1 = vpop.permute.xlu0 %22 }
  0x81   :  { %24 = vst [vmem:[#allocation5] sm:$0xff] %v23_v1 }
  0x82   :  { %74 = shalt.err (!%p71_p9)
}
  0x83   :  { %34 = dma.vmem_to_hbm [thread:$0]  %s32_s13, 128, %s107_s1, [#allocation4]  }
  0x84   :  { %85 = dma.done.wait [#allocation4], 128  }
  0x85   :  { %86 = vsyncadd [#allocation4], 4294967168 }
  0x86   :  { %38 = vsyncpa [#allocation3], 1 }
  0x87   :  { %39 = vsyncpa [#allocation4], 1 }

</bundles_post_ra>
